<compile_context>
chip_gen: v7x
topology: tpu7x:2x2x1
jax: 0.10.0
libtpu: 0.0.40
codegen_flags: <defaults>
</compile_context>

<pallas_src>
import jax
import jax.numpy as jnp
import numpy as np
from jax.experimental import pallas as pl
from jax.experimental.pallas import tpu as pltpu

N_EULER = 4  # fixed number of Euler sub-points per interval (N_EULER - 1 sub-steps)


def _decoder_kernel(dt_ref,                 # VMEM (R, 1)  per-row Euler sub-step dt (pre-divided)
                    data_ref,               # VMEM (R, C)  data rows, step-major / traj-minor
                    wtz_ref, btz_ref,       # VMEM (C, L), (1, L)   infer_transfer_z
                    wode_ref, bode_ref,     # VMEM (L, L), (1, L)   synthetic ode_func
                    wem_ref, bem_ref,       # VMEM (L, C), (1, C)   infer_emitter_z
                    out_ref):               # VMEM (R, PACK_W)  packed [states | probs | pad]
    latent_dim = wtz_ref.shape[1]
    cluster_num = wem_ref.shape[1]
    rows = data_ref.shape[0]

    x = data_ref[...]                                           # (R, C)

    # infer_transfer_z: Linear(cluster_num -> latent_dim)  (dropout = identity in eval)
    xi = jnp.dot(x, wtz_ref[...], preferred_element_type=jnp.float32) + btz_ref[...]

    # ODE evolution over [prev_t, t_i] with fixed-step explicit Euler (synthetic ode_func).
    # dt_ref already holds dt / (N_EULER - 1), broadcast per row in the wrapper.
    dt_sub = dt_ref[...]                                        # (R, 1)
    y = xi
    for _ in range(N_EULER - 1):
        f = jnp.tanh(jnp.dot(y, wode_ref[...], preferred_element_type=jnp.float32)
                     + bode_ref[...])
        y = y + f * dt_sub

    # infer_emitter_z + softmax over the cluster dim (reciprocal on the EUP slot).
    logits = jnp.dot(y, wem_ref[...], preferred_element_type=jnp.float32) + bem_ref[...]
    m = jnp.max(logits, axis=-1, keepdims=True)
    e = jnp.exp(logits - m)
    denom = jnp.sum(e, axis=-1, keepdims=True)
    probs = e * pl.reciprocal(denom, approx=True)

    # Single lane-dense (unmasked) store: pack states || probs || zero-pad to the full
    # 128-lane-aligned output width.
    pad = out_ref.shape[1] - (latent_dim + cluster_num)
    pieces = [y, probs]
    if pad > 0:
        pieces.append(jnp.zeros((rows, pad), jnp.float32))
    out_ref[...] = jnp.concatenate(pieces, axis=-1).astype(out_ref.dtype)


def _forward_impl(data, time_steps, params):
    """
    data:       (n_traj, n_tp, n_dims)   torch layout
    time_steps: (n_tp,)
    returns (latent_ys, latent_y_states) with torch shapes (1, n_steps, n_traj, dim).
    """
    n_traj, n_tp, n_dims = data.shape
    n_steps = n_tp - 1
    latent_dim = params["w_tz"].shape[0]        # torch weight layout (out, in)
    cluster_num = params["w_em"].shape[0]
    assert n_dims == cluster_num
    rows = n_steps * n_traj
    packed_w = ((latent_dim + cluster_num + 127) // 128) * 128   # lane-dense output width

    # Per-step time deltas: first step uses prev_t = t0 - 0.01; later steps use ts[i]-ts[i-1].
    deltas = jnp.concatenate(
        [jnp.array([0.01], jnp.float32),
         (time_steps[1:n_steps] - time_steps[:n_steps - 1]).astype(jnp.float32)])
    # Pre-divided Euler sub-step dt, repeated per trajectory -> (rows, 1) VMEM column.
    dt_sub = jnp.repeat(deltas / jnp.float32(N_EULER - 1), n_traj)[:, None]

    # Flatten (step, traj) into rows (step-major) so the kernel works on one 2D slab.
    data_rows = (jnp.transpose(data[:, :n_steps, :], (1, 0, 2))
                 .reshape(rows, n_dims).astype(jnp.float32))

    # Pre-transpose weights so the kernel computes x @ W_t (no in-kernel transpose).
    w_tz_t = params["w_tz"].T.astype(jnp.float32)                 # (C, L)
    b_tz = params["b_tz"].reshape(1, latent_dim).astype(jnp.float32)
    w_ode_t = params["w_ode"].T.astype(jnp.float32)               # (L, L)
    b_ode = params["b_ode"].reshape(1, latent_dim).astype(jnp.float32)
    w_em_t = params["w_em"].T.astype(jnp.float32)                 # (L, C)
    b_em = params["b_em"].reshape(1, cluster_num).astype(jnp.float32)

    in_specs = [pl.BlockSpec(memory_space=pltpu.MemorySpace.VMEM) for _ in range(8)]
    packed = pl.pallas_call(
        _decoder_kernel,
        out_shape=jax.ShapeDtypeStruct((rows, packed_w), jnp.float32),
        in_specs=in_specs,
        out_specs=pl.BlockSpec(memory_space=pltpu.MemorySpace.VMEM),
    )(dt_sub, data_rows, w_tz_t, b_tz, w_ode_t, b_ode, w_em_t, b_em)

    latent_y_states = packed[:, :latent_dim].reshape(n_steps, n_traj, latent_dim)[None]
    latent_ys = packed[:, latent_dim:latent_dim + cluster_num] \
        .reshape(n_steps, n_traj, cluster_num)[None]
    return latent_ys, latent_y_states


# jit the whole forward so the tiny wrapper-side transposes/reshapes/slices fuse with the
# surrounding XLA graph instead of becoming separate HBM round-trips.
decoder_ode_rnn_cluster2_forward = jax.jit(_forward_impl)


def _reference_forward(data, time_steps, params):
    """Pure-JAX reference mirroring the kernel semantics (for validation)."""
    n_traj, n_tp, _ = data.shape
    n_steps = n_tp - 1
    deltas = jnp.concatenate(
        [jnp.array([0.01], jnp.float32),
         (time_steps[1:n_steps] - time_steps[:n_steps - 1]).astype(jnp.float32)])
    ys, states = [], []
    for i in range(n_steps):
        x = data[:, i, :]
        xi = x @ params["w_tz"].T + params["b_tz"]
        dt_sub = deltas[i] / (N_EULER - 1)
        y = xi
        for _ in range(N_EULER - 1):
            y = y + jnp.tanh(y @ params["w_ode"].T + params["b_ode"]) * dt_sub
        logits = y @ params["w_em"].T + params["b_em"]
        ys.append(jax.nn.softmax(logits, axis=-1))
        states.append(y)
    return jnp.stack(ys, 0)[None], jnp.stack(states, 0)[None]


def _init_params(key, latent_dim, cluster_num):
    """Deterministic init mimicking nn.Linear default (uniform +-1/sqrt(fan_in))."""
    ks = jax.random.split(key, 8)

    def lin(kw, kb, out_dim, in_dim):
        bound = 1.0 / np.sqrt(in_dim)
        w = jax.random.uniform(kw, (out_dim, in_dim), jnp.float32, -bound, bound)
        b = jax.random.uniform(kb, (out_dim,), jnp.float32, -bound, bound)
        return w, b

    w_em, b_em = lin(ks[0], ks[1], cluster_num, latent_dim)   # infer_emitter_z
    w_tz, b_tz = lin(ks[2], ks[3], latent_dim, cluster_num)   # infer_transfer_z
    w_ode, b_ode = lin(ks[4], ks[5], latent_dim, latent_dim)  # synthetic ode_func
    # decayed_layer (Linear(1,1)) and GRU_unit_cluster weights exist in __init__ but are
    # unused on the run_odernn forward path; not materialized here.
    return dict(w_em=w_em, b_em=b_em, w_tz=w_tz, b_tz=b_tz, w_ode=w_ode, b_ode=b_ode)


if __name__ == "__main__":
    key = jax.random.PRNGKey(0)
    k_data, k_param = jax.random.split(key)

    n_traj, n_tp = 8, 9
    latent_dim, cluster_num = 32, 8           # n_dims == cluster_num (infer_transfer_z input)

    data = jax.random.normal(k_data, (n_traj, n_tp, cluster_num), jnp.float32)
    time_steps = jnp.linspace(0.0, 1.0, n_tp).astype(jnp.float32)
    params = _init_params(k_param, latent_dim, cluster_num)

    latent_ys, latent_y_states = decoder_ode_rnn_cluster2_forward(data, time_steps, params)
    jax.block_until_ready((latent_ys, latent_y_states))

    ref_ys, ref_states = _reference_forward(data, time_steps, params)
    # States: identical f32 math -> tight tolerance.
    np.testing.assert_allclose(np.asarray(latent_y_states), np.asarray(ref_states),
                               atol=1e-5, rtol=1e-4)
    # Probs: kernel uses pl.reciprocal(approx=True) for the softmax denom (EUP path),
    # so allow a slightly looser absolute tolerance on values in [0, 1].
    np.testing.assert_allclose(np.asarray(latent_ys), np.asarray(ref_ys),
                               atol=1e-3, rtol=1e-3)

    assert latent_ys.shape == (1, n_tp - 1, n_traj, cluster_num)
    assert latent_y_states.shape == (1, n_tp - 1, n_traj, latent_dim)
    print("KERNEL_OK")
</pallas_src>

<mosaic_0001>
module attributes {stable_mosaic.version = 11 : i64} {
  func.func @_decoder_kernel(%arg0: memref<64x1xf32, #tpu.memory_space<vmem>>, %arg1: memref<64x8xf32, #tpu.memory_space<vmem>>, %arg2: memref<8x32xf32, #tpu.memory_space<vmem>>, %arg3: memref<1x32xf32, #tpu.memory_space<vmem>>, %arg4: memref<32x32xf32, #tpu.memory_space<vmem>>, %arg5: memref<1x32xf32, #tpu.memory_space<vmem>>, %arg6: memref<32x8xf32, #tpu.memory_space<vmem>>, %arg7: memref<1x8xf32, #tpu.memory_space<vmem>>, %arg8: memref<64x128xf32, #tpu.memory_space<vmem>>) attributes {dimension_semantics = [], scalar_prefetch = 0 : i64, scratch_operands = 0 : i64, tpu.core_type = #tpu.core_type<tc>} {
    %c0 = arith.constant 0 : index
    %c0_0 = arith.constant 0 : index
    %0 = vector.load %arg1[%c0, %c0_0] : memref<64x8xf32, #tpu.memory_space<vmem>>, vector<64x8xf32>
    %c0_1 = arith.constant 0 : index
    %c0_2 = arith.constant 0 : index
    %1 = vector.load %arg2[%c0_1, %c0_2] : memref<8x32xf32, #tpu.memory_space<vmem>>, vector<8x32xf32>
    %cst = arith.constant dense<0.000000e+00> : vector<64x32xf32>
    %2 = tpu.matmul %0, %1, %cst {dimension_numbers = #tpu.dot_dimension_numbers<[1], [0], [0], [1], [0, 0, 1, 1], [], []>} : vector<64x8xf32>, vector<8x32xf32>, vector<64x32xf32> -> vector<64x32xf32>
    %c0_3 = arith.constant 0 : index
    %c0_4 = arith.constant 0 : index
    %3 = vector.load %arg3[%c0_3, %c0_4] : memref<1x32xf32, #tpu.memory_space<vmem>>, vector<1x32xf32>
    %4 = vector.broadcast %3 : vector<1x32xf32> to vector<64x32xf32>
    %5 = arith.addf %2, %4 : vector<64x32xf32>
    %c0_5 = arith.constant 0 : index
    %c0_6 = arith.constant 0 : index
    %6 = vector.load %arg0[%c0_5, %c0_6] : memref<64x1xf32, #tpu.memory_space<vmem>>, vector<64x1xf32>
    %c0_7 = arith.constant 0 : index
    %c0_8 = arith.constant 0 : index
    %7 = vector.load %arg4[%c0_7, %c0_8] : memref<32x32xf32, #tpu.memory_space<vmem>>, vector<32x32xf32>
    %cst_9 = arith.constant dense<0.000000e+00> : vector<64x32xf32>
    %8 = tpu.matmul %5, %7, %cst_9 {dimension_numbers = #tpu.dot_dimension_numbers<[1], [0], [0], [1], [0, 0, 1, 1], [], []>} : vector<64x32xf32>, vector<32x32xf32>, vector<64x32xf32> -> vector<64x32xf32>
    %c0_10 = arith.constant 0 : index
    %c0_11 = arith.constant 0 : index
    %9 = vector.load %arg5[%c0_10, %c0_11] : memref<1x32xf32, #tpu.memory_space<vmem>>, vector<1x32xf32>
    %10 = vector.broadcast %9 : vector<1x32xf32> to vector<64x32xf32>
    %11 = arith.addf %8, %10 : vector<64x32xf32>
    %12 = math.tanh %11 : vector<64x32xf32>
    %13 = vector.broadcast %6 : vector<64x1xf32> to vector<64x32xf32>
    %14 = arith.mulf %12, %13 : vector<64x32xf32>
    %15 = arith.addf %5, %14 : vector<64x32xf32>
    %c0_12 = arith.constant 0 : index
    %c0_13 = arith.constant 0 : index
    %16 = vector.load %arg4[%c0_12, %c0_13] : memref<32x32xf32, #tpu.memory_space<vmem>>, vector<32x32xf32>
    %cst_14 = arith.constant dense<0.000000e+00> : vector<64x32xf32>
    %17 = tpu.matmul %15, %16, %cst_14 {dimension_numbers = #tpu.dot_dimension_numbers<[1], [0], [0], [1], [0, 0, 1, 1], [], []>} : vector<64x32xf32>, vector<32x32xf32>, vector<64x32xf32> -> vector<64x32xf32>
    %c0_15 = arith.constant 0 : index
    %c0_16 = arith.constant 0 : index
    %18 = vector.load %arg5[%c0_15, %c0_16] : memref<1x32xf32, #tpu.memory_space<vmem>>, vector<1x32xf32>
    %19 = vector.broadcast %18 : vector<1x32xf32> to vector<64x32xf32>
    %20 = arith.addf %17, %19 : vector<64x32xf32>
    %21 = math.tanh %20 : vector<64x32xf32>
    %22 = vector.broadcast %6 : vector<64x1xf32> to vector<64x32xf32>
    %23 = arith.mulf %21, %22 : vector<64x32xf32>
    %24 = arith.addf %15, %23 : vector<64x32xf32>
    %c0_17 = arith.constant 0 : index
    %c0_18 = arith.constant 0 : index
    %25 = vector.load %arg4[%c0_17, %c0_18] : memref<32x32xf32, #tpu.memory_space<vmem>>, vector<32x32xf32>
    %cst_19 = arith.constant dense<0.000000e+00> : vector<64x32xf32>
    %26 = tpu.matmul %24, %25, %cst_19 {dimension_numbers = #tpu.dot_dimension_numbers<[1], [0], [0], [1], [0, 0, 1, 1], [], []>} : vector<64x32xf32>, vector<32x32xf32>, vector<64x32xf32> -> vector<64x32xf32>
    %c0_20 = arith.constant 0 : index
    %c0_21 = arith.constant 0 : index
    %27 = vector.load %arg5[%c0_20, %c0_21] : memref<1x32xf32, #tpu.memory_space<vmem>>, vector<1x32xf32>
    %28 = vector.broadcast %27 : vector<1x32xf32> to vector<64x32xf32>
    %29 = arith.addf %26, %28 : vector<64x32xf32>
    %30 = math.tanh %29 : vector<64x32xf32>
    %31 = vector.broadcast %6 : vector<64x1xf32> to vector<64x32xf32>
    %32 = arith.mulf %30, %31 : vector<64x32xf32>
    %33 = arith.addf %24, %32 : vector<64x32xf32>
    %c0_22 = arith.constant 0 : index
    %c0_23 = arith.constant 0 : index
    %34 = vector.load %arg6[%c0_22, %c0_23] : memref<32x8xf32, #tpu.memory_space<vmem>>, vector<32x8xf32>
    %cst_24 = arith.constant dense<0.000000e+00> : vector<64x8xf32>
    %35 = tpu.matmul %33, %34, %cst_24 {dimension_numbers = #tpu.dot_dimension_numbers<[1], [0], [0], [1], [0, 0, 1, 1], [], []>} : vector<64x32xf32>, vector<32x8xf32>, vector<64x8xf32> -> vector<64x8xf32>
    %c0_25 = arith.constant 0 : index
    %c0_26 = arith.constant 0 : index
    %36 = vector.load %arg7[%c0_25, %c0_26] : memref<1x8xf32, #tpu.memory_space<vmem>>, vector<1x8xf32>
    %37 = vector.broadcast %36 : vector<1x8xf32> to vector<64x8xf32>
    %38 = arith.addf %35, %37 : vector<64x8xf32>
    %cst_27 = arith.constant dense<0xFF800000> : vector<64xf32>
    %39 = vector.multi_reduction <maximumf>, %38, %cst_27 [1] : vector<64x8xf32> to vector<64xf32>
    %40 = vector.shape_cast %39 : vector<64xf32> to vector<64x1xf32>
    %41 = vector.broadcast %40 : vector<64x1xf32> to vector<64x8xf32>
    %42 = arith.subf %38, %41 : vector<64x8xf32>
    %43 = math.exp %42 : vector<64x8xf32>
    %cst_28 = arith.constant dense<0.000000e+00> : vector<64xf32>
    %44 = vector.multi_reduction <add>, %43, %cst_28 [1] : vector<64x8xf32> to vector<64xf32>
    %45 = vector.shape_cast %44 : vector<64xf32> to vector<64x1xf32>
    %46 = tpu.reciprocal %45 {approx = true} : vector<64x1xf32> -> vector<64x1xf32>
    %47 = vector.broadcast %46 : vector<64x1xf32> to vector<64x8xf32>
    %48 = arith.mulf %43, %47 : vector<64x8xf32>
    %cst_29 = arith.constant 0.000000e+00 : f32
    %49 = vector.broadcast %cst_29 : f32 to vector<64x88xf32>
    %50 = tpu.concatenate %33, %48, %49 in 1 : vector<64x32xf32>, vector<64x8xf32>, vector<64x88xf32> -> vector<64x128xf32>
    %c0_30 = arith.constant 0 : index
    %c0_31 = arith.constant 0 : index
    %51 = vector.load %arg8[%c0_30, %c0_31] : memref<64x128xf32, #tpu.memory_space<vmem>>, vector<64x128xf32>
    tpu.vector_store %arg8[%c0_30, %c0_31], %50 {strides = array<i32>} : memref<64x128xf32, #tpu.memory_space<vmem>>, vector<64x128xf32>,
    return
  }
}

</mosaic_0001>

<bundles_post_ra>
// kernel: _forward_impl.1
= control target key start
LH: loop header
LB: loop body
LE: loop exit
PB: predicated region body
PF: predicated region fallthrough
CT: control target
= control target key end

     0   :  { %vm45_vm0 = vcmask 64512   ;;  %v1295_v15 = vmov 0   ;;  %vm194_vm1 = vcmask 261120   ;;  %vm962_vm2 = vcmask 326656   ;;  %s1672_s2 = inlined_call_operand.vmem [shape: f32[8,32], index: 2, kind: input, shape index: {}]   ;;  %s1673_s1 = inlined_call_operand.vmem [shape: f32[64,8], index: 1, kind: input, shape index: {}]   ;;  %s1674_s4 = inlined_call_operand.vmem [shape: f32[32,32], index: 4, kind: input, shape index: {}]   ;;  %s1675_s0 = inlined_call_operand.vmem [shape: f32[64,1], index: 0, kind: input, shape index: {}]   ;;  %s1676_s3 = inlined_call_operand.vmem [shape: f32[1,32], index: 3, kind: input, shape index: {}]   ;;  %s1677_s5 = inlined_call_operand.vmem [shape: f32[1,32], index: 5, kind: input, shape index: {}]   ;;  %s1678_s6 = inlined_call_operand.vmem [shape: f32[32,8], index: 6, kind: input, shape index: {}]   ;;  %s1679_s7 = inlined_call_operand.vmem [shape: f32[1,8], index: 7, kind: input, shape index: {}]   ;;  %s1680_s8 = inlined_call_operand.vmem [shape: f32[64,128], index: 8, kind: output, shape index: {}]  }
   0x1   :  { %v37_v0 = vld [vmem:[%s1672_s2] sm:$0xff]  ;;  %v30_v2 = vld [vmem:[%s1673_s1 + $0x8] sm:$0xff]  ;;  %v31_v3 = vld [vmem:[%s1673_s1 + $0x10] sm:$0xff]  ;;  %1213 = vset.pattern.permute.xlu0 %v1295_v15  ;;  %1214 = vset.pattern.permute.xlu1 %v1295_v15 }
   0x2   :  { %v29_v1 = vld [vmem:[%s1673_s1] sm:$0xff]  ;;  %1083 = vmatprep.subr.mxu0 %v37_v0  ;;  %1209 = vmatprep.subr.mxu1 %v37_v0  ;;  %v34_v5 = vld [vmem:[%s1673_s1 + $0x28] sm:$0xff]  ;;  %v35_v6 = vld [vmem:[%s1673_s1 + $0x30] sm:$0xff] }
   0x3   :  { %1085 = vmatprep.mubr.msk.f32.mxu0 %vm45_vm0, %v29_v1  ;;  %v33_v4 = vld [vmem:[%s1673_s1 + $0x20] sm:$0xff]  ;;  %1084 = vmatpush3.msra.mxu0 %v37_v0  ;;  %v184_v8 = vld [vmem:[%s1674_s4 + $0x8] sm:$0xff]  ;;  %v32_v9 = vld [vmem:[%s1673_s1 + $0x18] sm:$0xff] }
   0x4   :  { %1086 = vmatmul.mubr.msk.f32.vlgmr.msra.gmra.mrb[0].mxu0 %vm45_vm0, %v30_v2  ;;  %1210 = vmatpush3.msra.mxu1 %v37_v0  ;;  %v183_v7 = vld [vmem:[%s1674_s4] sm:$0xff]  ;;  %v36_v11 = vld [vmem:[%s1673_s1 + $0x38] sm:$0xff]  ;;  %v185_v12 = vld [vmem:[%s1674_s4 + $0x10] sm:$0xff] }
   0x5   :  { %1088 = vmatprep.mubr.msk.f32.mxu0 %vm45_vm0, %v31_v3  ;;  %1091 = vmatprep.mubr.msk.f32.mxu1 %vm45_vm0, %v33_v4  ;;  %v1177_v10 = vpack.c.bf16 %v184_v8, %v183_v7  ;;  %v186_v13 = vld [vmem:[%s1674_s4 + $0x18] sm:$0xff]  ;;  %v175_v16 = vld [vmem:[%s1675_s0] sm:$0xff]  ;;  %v177_v17 = vld [vmem:[%s1675_s0 + $0x10] sm:$0xff] }
   0x6   :  { %1092 = vmatmul.mubr.msk.f32.vlgmr.msra.gmra.mrb[0].mxu1 %vm45_vm0, %v34_v5  ;;  %v1181_v14 = vpack.c.bf16 %v186_v13, %v185_v12  ;;  %334 = vperm.xlu0 %1213, %v175_v16   ;;  %v176_v18 = vld [vmem:[%s1675_s0 + $0x8] sm:$0xff]  ;;  %v178_v19 = vld [vmem:[%s1675_s0 + $0x18] sm:$0xff]  ;;  %v179_v20 = vld [vmem:[%s1675_s0 + $0x20] sm:$0xff] }
   0x7   :  { %1094 = vmatprep.mubr.msk.f32.mxu1 %vm45_vm0, %v35_v6  ;;  %1178 = vmatprep.subr.bf16.mxu1 %v1177_v10  ;;  %v180_v21 = vld [vmem:[%s1675_s0 + $0x28] sm:$0xff]  ;;  %v181_v22 = vld [vmem:[%s1675_s0 + $0x30] sm:$0xff]  ;;  %v182_v23 = vld [vmem:[%s1675_s0 + $0x38] sm:$0xff] }
   0x8   :  { %1089 = vmatmul.mubr.msk.f32.gmra.mrb[2].mxu0 %vm45_vm0, %v32_v9  ;;  %1180 = vmatpush3.bf16.msra.mxu1 %v1177_v10  ;;  %v983_v24 = vld [vmem:[%s1676_s3] ss:$0 sm:$0xff] }
   0x9   :  { %1186 = vmatprep.subr.bf16.mxu0 %v1177_v10  ;;  %1182 = vmatprep.subr.bf16.mxu1 %v1181_v14  ;;  %v1442_v41 = vld [vmem:[%s1677_s5] ss:$0 sm:$0xff] }
   0xa   :  { %1095 = vmatmul.mubr.msk.f32.gmra.mrb[2].mxu1 %vm45_vm0, %v36_v11  ;;  %1188 = vmatpush3.bf16.msra.mxu0 %v1177_v10 }
   0xb   :  { %1190 = vmatprep.subr.bf16.mxu0 %v1181_v14  ;;  %344 = vperm.xlu1 %1214, %v177_v17  }
   0xc   :  { %1184 = vmatpush3.bf16.msra.mxu1 %v1181_v14  ;;  %339 = vperm.xlu0 %1213, %v176_v18  }
   0xd   :  { %1194 = vmatprep.subr.bf16.mxu1 %v1177_v10 }
   0xe   :  { %1192 = vmatpush3.bf16.msra.mxu0 %v1181_v14 }
   0xf   :  { %349 = vperm.xlu1 %1214, %v178_v19  }
  0x10   :  { %354 = vperm.xlu0 %1213, %v179_v20  }
  0x13   :  { %359 = vperm.xlu1 %1214, %v180_v21  }
  0x14   :  { %364 = vperm.xlu0 %1213, %v181_v22  }
  0x17   :  { %369 = vperm.xlu1 %1214, %v182_v23  }
  0x85   :  { %v1447_v49 = vpop.permute.xlu0 %334 }
  0x8a   :  { %v1450_v51 = vpop.permute.xlu1 %344 }
  0x8b   :  { %v1454_v56 = vpop.permute.xlu0 %339 }
  0x8e   :  { %v1456_v59 = vpop.permute.xlu1 %349 }
  0x8f   :  { %v1467_v9 = vpop.permute.xlu0 %354 }
  0x92   :  { %v1463_v7 = vpop.permute.xlu1 %359 }
  0x93   :  { %v1478_v20 = vpop.permute.xlu0 %364 }
  0x96   :  { %v1475_v17 = vpop.permute.xlu1 %369 }
  0xd7   :  { %v1087_v25 = vpop.f32.mrb[0].mxu0 }
  0xd8   :  { %v136_v26 = vpop.f32.mrb[1].mxu0  ;;  %v142_v29 = vadd.f32 %v1087_v25, %v983_v24 }
  0xd9   :  { %v137_v27 = vadd.f32 %v983_v24, %v136_v26  ;;  %v1093_v28 = vpop.f32.mrb[0].mxu1 }
  0xda   :  { %v156_v30 = vpop.f32.mrb[1].mxu1  ;;  %v1423_v38 = vadd.f32 %v1093_v28, %v983_v24 }
  0xdb   :  { %v1090_v31 = vpop.f32.mrb[2].mxu0  ;;  %1105 = vmatprep.mubr.msk.f32.mxu1 %vm194_vm1, %v137_v27  ;;  %v1420_v35 = vadd.f32 %v983_v24, %v156_v30 }
  0xdc   :  { %v1417_v32 = vadd.f32 %v1090_v31, %v983_v24  ;;  %v146_v33 = vpop.f32.mrb[3].mxu0  ;;  %1106 = vmatmul.mubr.msk.f32.vlgmr.msra.gmra.mrb[4].mxu1 %vm194_vm1, %v142_v29 }
  0xdd   :  { %v147_v34 = vadd.f32 %v983_v24, %v146_v33  ;;  %v1096_v36 = vpop.f32.mrb[2].mxu1  ;;  %1196 = vmatpush3.bf16.msra.mxu1 %v1177_v10 }
  0xde   :  { %v166_v37 = vpop.f32.mrb[3].mxu1  ;;  %1198 = vmatprep.subr.bf16.mxu1 %v1181_v14  ;;  %v1431_v40 = vadd.f32 %v1096_v36, %v983_v24 }
  0xdf   :  { %1108 = vmatprep.mubr.msk.f32.mxu1 %vm194_vm1, %v147_v34  ;;  %v1429_v39 = vadd.f32 %v983_v24, %v166_v37 }
  0xe0   :  { %1109 = vmatmul.mubr.msk.f32.gmra.mrb[6].mxu1 %vm194_vm1, %v1417_v32 }
  0xe1   :  { %1111 = vmatprep.mubr.msk.f32.mxu1 %vm194_vm1, %v1420_v35  ;;  %1200 = vmatpush3.bf16.msra.mxu1 %v1181_v14 }
  0xe4   :  { %1112 = vmatmul.mubr.msk.f32.gmra.mrb[8].mxu1 %vm194_vm1, %v1423_v38 }
  0xe5   :  { %1114 = vmatprep.mubr.msk.f32.mxu1 %vm194_vm1, %v1429_v39 }
  0xe8   :  { %1115 = vmatmul.mubr.msk.f32.gmra.mrb[10].mxu1 %vm194_vm1, %v1431_v40 }
 0x1af   :  { %v1107_v42 = vpop.f32.mrb[4].mxu1 }
 0x1b0   :  { %v291_v43 = vadd.f32 %v1107_v42, %v1442_v41  ;;  %v285_v44 = vpop.f32.mrb[5].mxu1 }
 0x1b1   :  { %v286_v45 = vadd.f32 %v1442_v41, %v285_v44 }
 0x1b2   :  { %1215 = vtanh.f32 %v291_v43 }
 0x1b3   :  { %1217 = vtanh.f32 %v286_v45  ;;  %v1110_v46 = vpop.f32.mrb[6].mxu1 }
 0x1b4   :  { %v301_v47 = vadd.f32 %v1110_v46, %v1442_v41  ;;  %v295_v48 = vpop.f32.mrb[7].mxu1 }
 0x1b5   :  { %v296_v50 = vadd.f32 %v1442_v41, %v295_v48 }
 0x1b6   :  { %1219 = vtanh.f32 %v301_v47 }
 0x1b7   :  { %1221 = vtanh.f32 %v296_v50  ;;  %v1113_v52 = vpop.f32.mrb[8].mxu1 }
 0x1b8   :  { %v311_v53 = vadd.f32 %v1113_v52, %v1442_v41  ;;  %v305_v54 = vpop.f32.mrb[9].mxu1 }
 0x1b9   :  { %v306_v55 = vadd.f32 %v1442_v41, %v305_v54 }
 0x1ba   :  { %1223 = vtanh.f32 %v311_v53 }
 0x1bb   :  { %1225 = vtanh.f32 %v306_v55  ;;  %v1116_v57 = vpop.f32.mrb[10].mxu1 }
 0x1bc   :  { %v1216_v58 = vpop.eup %1215  ;;  %v321_v60 = vadd.f32 %v1116_v57, %v1442_v41  ;;  %v315_v61 = vpop.f32.mrb[11].mxu1 }
 0x1bd   :  { %v1218_v62 = vpop.eup %1217  ;;  %v373_v63 = vmul.f32 %v1216_v58, %v1454_v56  ;;  %v316_v0 = vadd.f32 %v1442_v41, %v315_v61 }
 0x1be   :  { %1227 = vtanh.f32 %v321_v60  ;;  %v372_v1 = vmul.f32 %v1218_v62, %v1447_v49 }
 0x1bf   :  { %1229 = vtanh.f32 %v316_v0  ;;  %v381_v5 = vadd.f32 %v373_v63, %v142_v29 }
 0x1c0   :  { %v1220_v2 = vpop.eup %1219  ;;  %v380_v3 = vadd.f32 %v372_v1, %v137_v27 }
 0x1c1   :  { %v1222_v4 = vpop.eup %1221  ;;  %v375_v6 = vmul.f32 %v1220_v2, %v1456_v59 }
 0x1c2   :  { %1125 = vmatprep.mubr.msk.f32.mxu0 %vm194_vm1, %v380_v3  ;;  %v374_v8 = vmul.f32 %v1222_v4, %v1450_v51 }
 0x1c3   :  { %1126 = vmatmul.mubr.msk.f32.vlgmr.msra.gmra.mrb[4].mxu0 %vm194_vm1, %v381_v5  ;;  %v383_v13 = vadd.f32 %v375_v6, %v1417_v32 }
 0x1c4   :  { %v1224_v10 = vpop.eup %1223  ;;  %v382_v11 = vadd.f32 %v374_v8, %v147_v34  ;;  %v694_v8 = vld [vmem:[%s1678_s6] sm:$0xff] }
 0x1c5   :  { %v1226_v12 = vpop.eup %1225  ;;  %v377_v14 = vmul.f32 %v1224_v10, %v1463_v7  ;;  %v695_v10 = vld [vmem:[%s1678_s6 + $0x8] sm:$0xff] }
 0x1c6   :  { %1128 = vmatprep.mubr.msk.f32.mxu0 %vm194_vm1, %v382_v11  ;;  %v376_v15 = vmul.f32 %v1226_v12, %v1467_v9  ;;  %v696_v12 = vld [vmem:[%s1678_s6 + $0x10] sm:$0xff] }
 0x1c7   :  { %1129 = vmatmul.mubr.msk.f32.gmra.mrb[6].mxu0 %vm194_vm1, %v383_v13  ;;  %v385_v21 = vadd.f32 %v377_v14, %v1423_v38 }
 0x1c8   :  { %v1228_v16 = vpop.eup %1227  ;;  %v384_v18 = vadd.f32 %v376_v15, %v1420_v35 }
 0x1c9   :  { %v1230_v19 = vpop.eup %1229  ;;  %v379_v22 = vmul.f32 %v1228_v16, %v1475_v17 }
 0x1ca   :  { %1131 = vmatprep.mubr.msk.f32.mxu0 %vm194_vm1, %v384_v18  ;;  %v378_v23 = vmul.f32 %v1230_v19, %v1478_v20 }
 0x1cb   :  { %1132 = vmatmul.mubr.msk.f32.gmra.mrb[8].mxu0 %vm194_vm1, %v385_v21  ;;  %v387_v25 = vadd.f32 %v379_v22, %v1431_v40 }
 0x1cc   :  { %v386_v24 = vadd.f32 %v378_v23, %v1429_v39 }
 0x1ce   :  { %1134 = vmatprep.mubr.msk.f32.mxu0 %vm194_vm1, %v386_v24 }
 0x1cf   :  { %1135 = vmatmul.mubr.msk.f32.gmra.mrb[10].mxu0 %vm194_vm1, %v387_v25 }
 0x296   :  { %v1127_v26 = vpop.f32.mrb[4].mxu0 }
 0x297   :  { %v484_v27 = vadd.f32 %v1127_v26, %v1442_v41  ;;  %v478_v28 = vpop.f32.mrb[5].mxu0 }
 0x298   :  { %v479_v29 = vadd.f32 %v1442_v41, %v478_v28 }
 0x299   :  { %1231 = vtanh.f32 %v484_v27 }
 0x29a   :  { %1233 = vtanh.f32 %v479_v29  ;;  %v1130_v30 = vpop.f32.mrb[6].mxu0 }
 0x29b   :  { %v494_v31 = vadd.f32 %v1130_v30, %v1442_v41  ;;  %v488_v32 = vpop.f32.mrb[7].mxu0 }
 0x29c   :  { %v489_v33 = vadd.f32 %v1442_v41, %v488_v32 }
 0x29d   :  { %1235 = vtanh.f32 %v494_v31 }
 0x29e   :  { %1237 = vtanh.f32 %v489_v33  ;;  %v1133_v34 = vpop.f32.mrb[8].mxu0 }
 0x29f   :  { %v504_v35 = vadd.f32 %v1133_v34, %v1442_v41  ;;  %v498_v36 = vpop.f32.mrb[9].mxu0 }
 0x2a0   :  { %v499_v37 = vadd.f32 %v1442_v41, %v498_v36 }
 0x2a1   :  { %1239 = vtanh.f32 %v504_v35 }
 0x2a2   :  { %1241 = vtanh.f32 %v499_v37  ;;  %v1136_v38 = vpop.f32.mrb[10].mxu0 }
 0x2a3   :  { %v1232_v39 = vpop.eup %1231  ;;  %v514_v40 = vadd.f32 %v1136_v38, %v1442_v41  ;;  %v508_v42 = vpop.f32.mrb[11].mxu0 }
 0x2a4   :  { %v1234_v43 = vpop.eup %1233  ;;  %v526_v44 = vmul.f32 %v1232_v39, %v1454_v56  ;;  %v509_v45 = vadd.f32 %v1442_v41, %v508_v42 }
 0x2a5   :  { %1243 = vtanh.f32 %v514_v40  ;;  %v525_v46 = vmul.f32 %v1234_v43, %v1447_v49 }
 0x2a6   :  { %1245 = vtanh.f32 %v509_v45  ;;  %v1501_v52 = vadd.f32 %v526_v44, %v381_v5 }
 0x2a7   :  { %v1236_v47 = vpop.eup %1235  ;;  %v1499_v48 = vadd.f32 %v525_v46, %v380_v3 }
 0x2a8   :  { %v1238_v50 = vpop.eup %1237  ;;  %v528_v53 = vmul.f32 %v1236_v47, %v1456_v59 }
 0x2a9   :  { %1145 = vmatprep.mubr.msk.f32.mxu1 %vm194_vm1, %v1499_v48  ;;  %v527_v54 = vmul.f32 %v1238_v50, %v1450_v51 }
 0x2aa   :  { %1146 = vmatmul.mubr.msk.f32.vlgmr.msra.gmra.mrb[12].mxu1 %vm194_vm1, %v1501_v52  ;;  %v1511_v60 = vadd.f32 %v528_v53, %v383_v13  ;;  %v697_v13 = vld [vmem:[%s1678_s6 + $0x18] sm:$0xff] }
 0x2ab   :  { %v1240_v55 = vpop.eup %1239  ;;  %v1509_v57 = vadd.f32 %v527_v54, %v382_v11  ;;  %v1201_v11 = vpack.c.bf16 %v695_v10, %v694_v8  ;;  %v1205_v14 = vpack.c.bf16 %v697_v13, %v696_v12 }
 0x2ac   :  { %v1242_v58 = vpop.eup %1241  ;;  %v530_v61 = vmul.f32 %v1240_v55, %v1463_v7 }
 0x2ad   :  { %1148 = vmatprep.mubr.msk.f32.mxu1 %vm194_vm1, %v1509_v57  ;;  %v529_v62 = vmul.f32 %v1242_v58, %v1467_v9  ;;  %1202 = vmatprep.subr.bf16.mxu0 %v1201_v11 }
 0x2ae   :  { %1149 = vmatmul.mubr.msk.f32.gmra.mrb[14].mxu1 %vm194_vm1, %v1511_v60  ;;  %v1521_v2 = vadd.f32 %v530_v61, %v385_v21  ;;  %1204 = vmatpush3.bf16.msra.mxu0 %v1201_v11 }
 0x2af   :  { %v1244_v63 = vpop.eup %1243  ;;  %v1519_v0 = vadd.f32 %v529_v62, %v384_v18  ;;  %1206 = vmatprep.subr.bf16.mxu0 %v1205_v14 }
 0x2b0   :  { %v1246_v1 = vpop.eup %1245  ;;  %v532_v3 = vmul.f32 %v1244_v63, %v1475_v17 }
 0x2b1   :  { %1151 = vmatprep.mubr.msk.f32.mxu1 %vm194_vm1, %v1519_v0  ;;  %v531_v4 = vmul.f32 %v1246_v1, %v1478_v20 }
 0x2b2   :  { %1152 = vmatmul.mubr.msk.f32.gmra.mrb[16].mxu1 %vm194_vm1, %v1521_v2  ;;  %v1531_v6 = vadd.f32 %v532_v3, %v387_v25  ;;  %1208 = vmatpush3.bf16.msra.mxu0 %v1205_v14 }
 0x2b3   :  { %v1529_v5 = vadd.f32 %v531_v4, %v386_v24 }
 0x2b5   :  { %1154 = vmatprep.mubr.msk.f32.mxu1 %vm194_vm1, %v1529_v5 }
 0x2b6   :  { %1155 = vmatmul.mubr.msk.f32.gmra.mrb[18].mxu1 %vm194_vm1, %v1531_v6 }
 0x37d   :  { %v1147_v15 = vpop.f32.mrb[12].mxu1 }
 0x37e   :  { %v637_v16 = vadd.f32 %v1147_v15, %v1442_v41  ;;  %v631_v18 = vpop.f32.mrb[13].mxu1 }
 0x37f   :  { %v632_v19 = vadd.f32 %v1442_v41, %v631_v18 }
 0x380   :  { %1247 = vtanh.f32 %v637_v16 }
 0x381   :  { %1249 = vtanh.f32 %v632_v19  ;;  %v1150_v21 = vpop.f32.mrb[14].mxu1 }
 0x382   :  { %v647_v22 = vadd.f32 %v1150_v21, %v1442_v41  ;;  %v641_v23 = vpop.f32.mrb[15].mxu1 }
 0x383   :  { %v642_v24 = vadd.f32 %v1442_v41, %v641_v23 }
 0x384   :  { %1251 = vtanh.f32 %v647_v22 }
 0x385   :  { %1253 = vtanh.f32 %v642_v24  ;;  %v1153_v25 = vpop.f32.mrb[16].mxu1 }
 0x386   :  { %v657_v26 = vadd.f32 %v1153_v25, %v1442_v41  ;;  %v651_v27 = vpop.f32.mrb[17].mxu1 }
 0x387   :  { %v652_v28 = vadd.f32 %v1442_v41, %v651_v27 }
 0x388   :  { %1255 = vtanh.f32 %v657_v26 }
 0x389   :  { %1257 = vtanh.f32 %v652_v28  ;;  %v1156_v29 = vpop.f32.mrb[18].mxu1 }
 0x38a   :  { %v1248_v30 = vpop.eup %1247  ;;  %v667_v31 = vadd.f32 %v1156_v29, %v1442_v41  ;;  %v661_v32 = vpop.f32.mrb[19].mxu1 }
 0x38b   :  { %v1250_v33 = vpop.eup %1249  ;;  %v679_v34 = vmul.f32 %v1248_v30, %v1454_v56  ;;  %v662_v35 = vadd.f32 %v1442_v41, %v661_v32 }
 0x38c   :  { %1259 = vtanh.f32 %v667_v31  ;;  %v678_v36 = vmul.f32 %v1250_v33, %v1447_v49 }
 0x38d   :  { %1261 = vtanh.f32 %v662_v35  ;;  %v1563_v40 = vadd.f32 %v679_v34, %v1501_v52 }
 0x38e   :  { %v1252_v37 = vpop.eup %1251  ;;  %v1560_v38 = vadd.f32 %v678_v36, %v1499_v48 }
 0x38f   :  { %v1254_v39 = vpop.eup %1253  ;;  %v681_v42 = vmul.f32 %v1252_v37, %v1456_v59 }
 0x390   :  { %1165 = vmatprep.mubr.msk.f32.mxu0 %vm194_vm1, %v1560_v38  ;;  %v680_v56 = vmul.f32 %v1254_v39, %v1450_v51 }
 0x391   :  { %1166 = vmatmul.mubr.msk.f32.vlgmr.msra.gmra.mrb[12].mxu0 %vm194_vm1, %v1563_v40  ;;  %v1575_v44 = vadd.f32 %v681_v42, %v1511_v60 }
 0x392   :  { %v1256_v41 = vpop.eup %1255  ;;  %v1572_v49 = vadd.f32 %v680_v56, %v1509_v57 }
 0x393   :  { %v1258_v43 = vpop.eup %1257  ;;  %v683_v45 = vmul.f32 %v1256_v41, %v1463_v7 }
 0x394   :  { %1168 = vmatprep.mubr.msk.f32.mxu0 %vm194_vm1, %v1572_v49  ;;  %v682_v59 = vmul.f32 %v1258_v43, %v1467_v9 }
 0x395   :  { %1169 = vmatmul.mubr.msk.f32.gmra.mrb[14].mxu0 %vm194_vm1, %v1575_v44  ;;  %v1587_v48 = vadd.f32 %v683_v45, %v1521_v2 }
 0x396   :  { %v1260_v51 = vpop.eup %1259  ;;  %v1584_v46 = vadd.f32 %v682_v59, %v1519_v0 }
 0x397   :  { %v1262_v47 = vpop.eup %1261  ;;  %v685_v50 = vmul.f32 %v1260_v51, %v1475_v17  ;;  %v1017_v17 = vld [vmem:[%s1679_s7] ss:$0 sm:$0xff]  ;;  %s1296_s7 = smov 32  }
 0x398   :  { %1171 = vmatprep.mubr.msk.f32.mxu0 %vm194_vm1, %v1584_v46  ;;  %v684_v7 = vmul.f32 %v1262_v47, %v1478_v20 }
 0x399   :  { %1172 = vmatmul.mubr.msk.f32.gmra.mrb[16].mxu0 %vm194_vm1, %v1587_v48  ;;  %v1599_v52 = vadd.f32 %v685_v50, %v1531_v6 }
 0x39a   :  { %v1596_v9 = vadd.f32 %v684_v7, %v1529_v5 }
 0x39c   :  { %1174 = vmatprep.mubr.msk.f32.mxu0 %vm194_vm1, %v1596_v9 }
 0x39d   :  { %1175 = vmatmul.mubr.msk.f32.gmra.mrb[18].mxu0 %vm194_vm1, %v1599_v52 }
 0x464   :  { %v1167_v20 = vpop.f32.mrb[12].mxu0 }
 0x465   :  { %v801_v53 = vadd.f32 %v1167_v20, %v1017_v17  ;;  %v795_v54 = vpop.f32.mrb[13].mxu0 }
 0x466   :  { %v796_v55 = vadd.f32 %v1017_v17, %v795_v54 }
 0x467   :  { %v837_v57 = vsel %vm45_vm0, %v801_v53, -inf }
 0x468   :  { %838 = vmax.xlane.f32.xlu1 %v837_v57  ;;  %v1170_v58 = vpop.f32.mrb[14].mxu0  ;;  %v834_v60 = vsel %vm45_vm0, %v796_v55, -inf }
 0x469   :  { %v811_v61 = vadd.f32 %v1170_v58, %v1017_v17  ;;  %v805_v62 = vpop.f32.mrb[15].mxu0  ;;  %835 = vmax.xlane.f32.xlu0 %v834_v60 }
 0x46a   :  { %v806_v0 = vadd.f32 %v1017_v17, %v805_v62 }
 0x46b   :  { %v843_v63 = vsel %vm45_vm0, %v811_v61, -inf }
 0x46c   :  { %v1173_v1 = vpop.f32.mrb[16].mxu0  ;;  %v840_v8 = vsel %vm45_vm0, %v806_v0, -inf }
 0x46d   :  { %v815_v2 = vpop.f32.mrb[17].mxu0  ;;  %844 = vmax.xlane.f32.xlu0 %v843_v63  ;;  %v821_v4 = vadd.f32 %v1173_v1, %v1017_v17 }
 0x46e   :  { %v816_v3 = vadd.f32 %v1017_v17, %v815_v2 }
 0x46f   :  { %v849_v13 = vsel %vm45_vm0, %v821_v4, -inf }
 0x470   :  { %v1176_v5 = vpop.f32.mrb[18].mxu0  ;;  %v846_v6 = vsel %vm45_vm0, %v816_v3, -inf }
 0x471   :  { %847 = vmax.xlane.f32.xlu1 %v846_v6  ;;  %841 = vmax.xlane.f32.xlu0 %v840_v8  ;;  %v825_v10 = vpop.f32.mrb[19].mxu0  ;;  %v831_v12 = vadd.f32 %v1176_v5, %v1017_v17 }
 0x472   :  { %v826_v11 = vadd.f32 %v1017_v17, %v825_v10 }
 0x473   :  { %v855_v15 = vsel %vm45_vm0, %v831_v12, -inf }
 0x474   :  { %v852_v14 = vsel %vm45_vm0, %v826_v11, -inf }
 0x475   :  { %850 = vmax.xlane.f32.xlu0 %v849_v13  ;;  %853 = vmax.xlane.f32.xlu1 %v852_v14 }
 0x479   :  { %856 = vmax.xlane.f32.xlu0 %v855_v15 }
 0x4f5   :  { %v839_v16 = vpop.xlane.xlu1 %838 }
 0x4f6   :  { %v859_v18 = vsub.f32 %v801_v53, %v839_v16  ;;  %v836_v19 = vpop.xlane.xlu0 %835 }
 0x4f7   :  { %v858_v21 = vsub.f32 %v796_v55, %v836_v19 }
 0x4f8   :  { %v868_v22 = vmul.f32 1.442695, %v859_v18 }
 0x4f9   :  { %v866_v23 = vmul.f32 1.442695, %v858_v21 }
 0x4fa   :  { %1263 = vpow2.f32 %v868_v22  ;;  %v845_v24 = vpop.xlane.xlu0 %844 }
 0x4fb   :  { %1265 = vpow2.f32 %v866_v23  ;;  %v861_v25 = vsub.f32 %v811_v61, %v845_v24 }
 0x4fd   :  { %v872_v26 = vmul.f32 1.442695, %v861_v25 }
 0x4fe   :  { %v848_v27 = vpop.xlane.xlu1 %847  ;;  %v842_v28 = vpop.xlane.xlu0 %841 }
 0x4ff   :  { %1267 = vpow2.f32 %v872_v26  ;;  %v862_v29 = vsub.f32 %v816_v3, %v848_v27  ;;  %v860_v30 = vsub.f32 %v806_v0, %v842_v28 }
 0x501   :  { %v870_v31 = vmul.f32 1.442695, %v860_v30  ;;  %v874_v32 = vmul.f32 1.442695, %v862_v29 }
 0x502   :  { %v851_v33 = vpop.xlane.xlu0 %850  ;;  %v854_v34 = vpop.xlane.xlu1 %853 }
 0x503   :  { %v863_v35 = vsub.f32 %v821_v4, %v851_v33  ;;  %v864_v36 = vsub.f32 %v826_v11, %v854_v34  ;;  %1269 = vpow2.f32 %v870_v31 }
 0x504   :  { %v1264_v37 = vpop.eup %1263  ;;  %1271 = vpow2.f32 %v874_v32 }
 0x505   :  { %v1266_v39 = vpop.eup %1265  ;;  %v876_v42 = vmul.f32 1.442695, %v863_v35  ;;  %v885_v56 = vsel %vm45_vm0, %v1264_v37, 0.0  ;;  %v878_v41 = vmul.f32 1.442695, %v864_v36 }
 0x506   :  { %886 = vadd.xlane.f32.xlu0 %v885_v56  ;;  %v857_v43 = vpop.xlane.xlu0 %856  ;;  %v882_v45 = vsel %vm45_vm0, %v1266_v39, 0.0 }
 0x507   :  { %1273 = vpow2.f32 %v876_v42  ;;  %v865_v59 = vsub.f32 %v831_v12, %v857_v43  ;;  %883 = vadd.xlane.f32.xlu1 %v882_v45 }
 0x508   :  { %1275 = vpow2.f32 %v878_v41 }
 0x509   :  { %v1268_v51 = vpop.eup %1267  ;;  %v880_v47 = vmul.f32 1.442695, %v865_v59 }
 0x50a   :  { %v891_v50 = vsel %vm45_vm0, %v1268_v51, 0.0 }
 0x50b   :  { %1277 = vpow2.f32 %v880_v47  ;;  %892 = vadd.xlane.f32.xlu0 %v891_v50 }
 0x50d   :  { %v1270_v7 = vpop.eup %1269 }
 0x50e   :  { %v888_v17 = vsel %vm45_vm0, %v1270_v7, 0.0  ;;  %v1272_v20 = vpop.eup %1271 }
 0x50f   :  { %889 = vadd.xlane.f32.xlu1 %v888_v17  ;;  %v894_v55 = vsel %vm45_vm0, %v1272_v20, 0.0 }
 0x511   :  { %v1274_v53 = vpop.eup %1273 }
 0x512   :  { %v897_v54 = vsel %vm45_vm0, %v1274_v53, 0.0  ;;  %v1276_v57 = vpop.eup %1275 }
 0x513   :  { %898 = vadd.xlane.f32.xlu0 %v897_v54  ;;  %895 = vadd.xlane.f32.xlu1 %v894_v55  ;;  %v900_v61 = vsel %vm45_vm0, %v1276_v57, 0.0 }
 0x515   :  { %v1278_v58 = vpop.eup %1277 }
 0x516   :  { %v903_v60 = vsel %vm45_vm0, %v1278_v58, 0.0 }
 0x517   :  { %904 = vadd.xlane.f32.xlu0 %v903_v60  ;;  %901 = vadd.xlane.f32.xlu1 %v900_v61 }
 0x593   :  { %v887_v62 = vpop.xlane.xlu0 %886 }
 0x594   :  { %1279 = vrcp.f32 %v887_v62  ;;  %v884_v63 = vpop.xlane.xlu1 %883 }
 0x595   :  { %1281 = vrcp.f32 %v884_v63 }
 0x598   :  { %v893_v0 = vpop.xlane.xlu0 %892 }
 0x599   :  { %1283 = vrcp.f32 %v893_v0 }
 0x59c   :  { %v890_v1 = vpop.xlane.xlu1 %889 }
 0x59d   :  { %1285 = vrcp.f32 %v890_v1 }
 0x59e   :  { %v1280_v2 = vpop.eup %1279 }
 0x59f   :  { %v1282_v3 = vpop.eup %1281  ;;  %v915_v4 = vmul.f32 %v1280_v2, %v1264_v37 }
 0x5a0   :  { %v899_v5 = vpop.xlane.xlu0 %898  ;;  %v914_v6 = vmul.f32 %v1282_v3, %v1266_v39  ;;  %v896_v8 = vpop.xlane.xlu1 %895 }
 0x5a1   :  { %1287 = vrcp.f32 %v899_v5  ;;  %932 = vrot.lane.b32.xlu0 %v915_v4, %s1296_s7 }
 0x5a2   :  { %1289 = vrcp.f32 %v896_v8  ;;  %930 = vrot.lane.b32.xlu1 %v914_v6, %s1296_s7 }
 0x5a3   :  { %v1284_v10 = vpop.eup %1283 }
 0x5a4   :  { %v905_v11 = vpop.xlane.xlu0 %904  ;;  %v917_v12 = vmul.f32 %v1284_v10, %v1268_v51  ;;  %v902_v13 = vpop.xlane.xlu1 %901 }
 0x5a5   :  { %1291 = vrcp.f32 %v905_v11 }
 0x5a6   :  { %1293 = vrcp.f32 %v902_v13  ;;  %936 = vrot.lane.b32.xlu1 %v917_v12, %s1296_s7 }
 0x5a7   :  { %v1286_v14 = vpop.eup %1285 }
 0x5a8   :  { %v916_v15 = vmul.f32 %v1286_v14, %v1270_v7 }
 0x5aa   :  { %934 = vrot.lane.b32.xlu1 %v916_v15, %s1296_s7 }
 0x5ab   :  { %v1288_v16 = vpop.eup %1287 }
 0x5ac   :  { %v1290_v18 = vpop.eup %1289  ;;  %v919_v19 = vmul.f32 %v1288_v16, %v1274_v53 }
 0x5ad   :  { %v918_v21 = vmul.f32 %v1290_v18, %v1272_v20 }
 0x5ae   :  { %940 = vrot.lane.b32.xlu1 %v919_v19, %s1296_s7 }
 0x5af   :  { %v1292_v22 = vpop.eup %1291  ;;  %938 = vrot.lane.b32.xlu0 %v918_v21, %s1296_s7 }
 0x5b0   :  { %v1294_v23 = vpop.eup %1293  ;;  %v921_v24 = vmul.f32 %v1292_v22, %v1278_v58 }
 0x5b1   :  { %v920_v25 = vmul.f32 %v1294_v23, %v1276_v57 }
 0x5b2   :  { %944 = vrot.lane.b32.xlu1 %v921_v24, %s1296_s7 }
 0x5b3   :  { %942 = vrot.lane.b32.xlu0 %v920_v25, %s1296_s7 }
 0x613   :  { %v933_v26 = vpop.permute.xlu0 %932 }
 0x614   :  { %v955_v27 = vsel %vm194_vm1, %v1563_v40, %v933_v26  ;;  %v931_v28 = vpop.permute.xlu1 %930 }
 0x615   :  { %v964_v29 = vsel %vm962_vm2, %v955_v27, 0.0  ;;  %v954_v30 = vsel %vm194_vm1, %v1560_v38, %v931_v28 }
 0x616   :  { %972 = vst [vmem:[%s1680_s8 + $0x8] sm:$0xff] %v964_v29  ;;  %v963_v31 = vsel %vm962_vm2, %v954_v30, 0.0 }
 0x617   :  { %971 = vst [vmem:[%s1680_s8] sm:$0xff] %v963_v31 }
 0x618   :  { %v937_v32 = vpop.permute.xlu1 %936 }
 0x619   :  { %v957_v40 = vsel %vm194_vm1, %v1575_v44, %v937_v32 }
 0x61a   :  { %v966_v33 = vsel %vm962_vm2, %v957_v40, 0.0 }
 0x61b   :  { %974 = vst [vmem:[%s1680_s8 + $0x18] sm:$0xff] %v966_v33 }
 0x61c   :  { %v935_v38 = vpop.permute.xlu1 %934 }
 0x61d   :  { %v956_v34 = vsel %vm194_vm1, %v1572_v49, %v935_v38 }
 0x61e   :  { %v965_v35 = vsel %vm962_vm2, %v956_v34, 0.0 }
 0x61f   :  { %973 = vst [vmem:[%s1680_s8 + $0x10] sm:$0xff] %v965_v35 }
 0x620   :  { %v941_v37 = vpop.permute.xlu1 %940 }
 0x621   :  { %v939_v36 = vpop.permute.xlu0 %938  ;;  %v959_v39 = vsel %vm194_vm1, %v1587_v48, %v941_v37 }
 0x622   :  { %v958_v44 = vsel %vm194_vm1, %v1584_v46, %v939_v36  ;;  %v968_v56 = vsel %vm962_vm2, %v959_v39, 0.0 }
 0x623   :  { %v967_v42 = vsel %vm962_vm2, %v958_v44, 0.0  ;;  %976 = vst [vmem:[%s1680_s8 + $0x28] sm:$0xff] %v968_v56 }
 0x624   :  { %975 = vst [vmem:[%s1680_s8 + $0x20] sm:$0xff] %v967_v42  ;;  %v945_v41 = vpop.permute.xlu1 %944 }
 0x625   :  { %v943_v49 = vpop.permute.xlu0 %942  ;;  %v961_v48 = vsel %vm194_vm1, %v1599_v52, %v945_v41 }
 0x626   :  { %v960_v46 = vsel %vm194_vm1, %v1596_v9, %v943_v49  ;;  %v970_v45 = vsel %vm962_vm2, %v961_v48, 0.0 }
 0x627   :  { %v969_v43 = vsel %vm962_vm2, %v960_v46, 0.0  ;;  %978 = vst [vmem:[%s1680_s8 + $0x38] sm:$0xff] %v970_v45 }
 0x628   :  { %977 = vst [vmem:[%s1680_s8 + $0x30] sm:$0xff] %v969_v43 }

</bundles_post_ra>
